<compile_context>
chip_gen: v6e
topology: v6e:2x2x1
jax: 0.10.0
libtpu: 0.0.40
codegen_flags: <defaults>
</compile_context>

<pallas_src>
import functools
from typing import NamedTuple

import jax
import jax.numpy as jnp
from jax.experimental import pallas as pl
from jax.experimental.pallas import tpu as pltpu

EPS = 1e-5
_MIB = 1024 * 1024


def _round_up(a, b):
    return ((a + b - 1) // b) * b


def _tpu_generation():
    """Best-effort TPU generation guess (5/6/7) from device_kind."""
    try:
        kind = jax.devices()[0].device_kind.lower()
    except Exception:
        return 6
    if "v7" in kind or "7x" in kind:
        return 7
    if "v6" in kind:
        return 6
    if "v5" in kind:
        return 5
    if "v4" in kind:
        return 4
    return 6


def _lane_align(gen):
    # v6e/v7x MXU is 2x256x256 -> pad D to 256; v5e MXU is 128x128 -> 128 is enough.
    return 256 if gen >= 6 else 128


def _vmem_budget_bytes(gen):
    """Scoped-VMEM limit for the kernel: physical capacity minus ~16 MiB headroom."""
    cap = None
    try:
        cap = int(pltpu.get_tpu_info().vmem_capacity_bytes)
    except Exception:
        cap = None
    phys = 64 * _MIB if gen >= 7 else 128 * _MIB
    cap = phys if cap is None else min(cap, phys)
    return max(cap - 16 * _MIB, 32 * _MIB)


# ---------------------------------------------------------------------------
# Kernels
# ---------------------------------------------------------------------------

def _layernorm_rows(z, cvec, *, inv_d, d, dp):
    """Fused LayerNorm over rows of z (f32). cvec rows: 0=bias, 1=gamma, 2=beta."""
    bias = cvec[0:1, :]
    gamma = cvec[1:2, :]
    beta = cvec[2:3, :]
    z = z + bias                                   # padded lanes stay exactly 0
    mean = jnp.sum(z, axis=-1, keepdims=True) * inv_d
    zc = z - mean
    if d != dp:                                    # mask padded lanes (they hold -mean)
        lanes = jax.lax.broadcasted_iota(jnp.int32, zc.shape, dimension=1)
        zc = jnp.where(lanes < d, zc, 0.0)
    var = jnp.sum(zc * zc, axis=-1, keepdims=True) * inv_d   # two-pass, no cancellation
    inv_std = jax.lax.rsqrt(jnp.maximum(var, 0.0) + EPS)
    return zc * inv_std * gamma + beta


def _residual_fused_kernel(x_ref, w_ref, cvec_ref, o_ref, *, inv_d, d, dp, mm_dtype):
    """Single-K-step path: whole (Dp, Dp) weight resident in VMEM."""
    x = x_ref[...]
    y = jnp.dot(x.astype(mm_dtype), w_ref[...], preferred_element_type=jnp.float32)
    z = x.astype(jnp.float32) + y                  # dropout (eval) = identity; residual in f32
    out = _layernorm_rows(z, cvec_ref[...], inv_d=inv_d, d=d, dp=dp)
    o_ref[...] = out.astype(o_ref.dtype)


def _residual_ktiled_kernel(x_chunk_ref, w_ref, x_full_ref, cvec_ref, o_ref, acc_ref,
                            *, inv_d, d, dp, mm_dtype):
    """K-tiled path: weight streamed as (TK, Dp) tiles, f32 accumulator in scratch."""
    k = pl.program_id(1)

    @pl.when(k == 0)
    def _init():
        acc_ref[...] = jnp.zeros_like(acc_ref)

    acc_ref[...] += jnp.dot(x_chunk_ref[...].astype(mm_dtype), w_ref[...],
                            preferred_element_type=jnp.float32)

    @pl.when(k == pl.num_programs(1) - 1)
    def _finalize():
        z = acc_ref[...] + x_full_ref[...].astype(jnp.float32)   # residual add in f32
        out = _layernorm_rows(z, cvec_ref[...], inv_d=inv_d, d=d, dp=dp)
        o_ref[...] = out.astype(o_ref.dtype)


# ---------------------------------------------------------------------------
# Parameter preparation (hoisted out of the forward path — do once, cache)
# ---------------------------------------------------------------------------

class ResidualParams(NamedTuple):
    wp: jax.Array      # [Dp, Dp] mm_dtype, consumed as y = x @ wp
    cvec: jax.Array    # [8, Dp] f32; rows 0..2 = bias, gamma, beta (rest zero)
    d: int             # true model dim
    dp: int            # lane-padded model dim


def prepare_residual_params(w, b, gamma, beta, *, mm_dtype=jnp.bfloat16):
    """Pad/cast/pack parameters once (not per forward call).

    w:            [D, D] linear weight, consumed as y = x @ w
                  (PyTorch Linear stores weight as [out, in] -> pass weight.T)
    b/gamma/beta: [D]
    """
    d = w.shape[0]
    assert w.shape == (d, d), "inner layer must be Linear(dim, dim)"
    gen = _tpu_generation()
    dp = _round_up(d, _lane_align(gen))
    pad = dp - d
    wp = jnp.pad(w, ((0, pad), (0, pad))).astype(mm_dtype)
    zero = jnp.zeros((dp,), jnp.float32)
    cvec = jnp.stack(
        [jnp.pad(b.astype(jnp.float32), (0, pad)),
         jnp.pad(gamma.astype(jnp.float32), (0, pad)),
         jnp.pad(beta.astype(jnp.float32), (0, pad)),
         zero, zero, zero, zero, zero], axis=0)               # [8, Dp] (sublane aligned)
    return ResidualParams(wp=wp, cvec=cvec, d=d, dp=dp)


# ---------------------------------------------------------------------------
# Tile planning (generation-aware)
# ---------------------------------------------------------------------------

def _fit_tk(tk, dp, lane):
    tk = int(max(lane, min(tk, dp)))
    tk = (tk // lane) * lane
    while dp % tk:
        tk -= lane
    return tk


def _choose_tiles(M, dp, x_isz, o_isz, w_isz, gen, budget, tm, tk):
    lane = _lane_align(gen)

    # ---- K tile: keep the whole weight resident (single-buffered) when it fits,
    # otherwise stream double-buffered (TK, Dp) weight tiles over a reduction axis.
    full_w = dp * dp * w_isz
    if tk is None:
        tk = dp if full_w <= budget // 2 else max((budget // 2) // (2 * dp * w_isz), lane)
    tk = _fit_tk(tk, dp, lane)
    nk = dp // tk
    w_foot = full_w if nk == 1 else 2 * tk * dp * w_isz

    # ---- M (row) tile: biggest that fits the remaining budget.
    if nk == 1:
        per_row = dp * (2 * x_isz + 2 * o_isz + 8)            # x/out double-buffered + f32 temps
    else:
        per_row = 2 * tk * x_isz + dp * (2 * x_isz + 2 * o_isz + 4 + 8)  # + f32 accumulator
    avail = max(budget - w_foot - 8 * dp * 4, per_row * 8)
    tm_max = max(avail // per_row, 8)
    tm = min(1024, tm_max) if tm is None else min(int(tm), tm_max)
    if tm >= 256:
        tm = (tm // 256) * 256                                # MXU-friendly row tiles
    else:
        tm = max((tm // 8) * 8, 8)
    tm = min(tm, _round_up(M, 8))
    if gen >= 7 and M >= 16:                                  # keep both v7x TensorCores busy
        tm = min(tm, _round_up((M + 1) // 2, 8))
    return tm, tk, nk


# ---------------------------------------------------------------------------
# Forward
# ---------------------------------------------------------------------------

def residual_forward(x, params: ResidualParams, *, tm=None, tk=None, out_dtype=None):
    """Fused LayerNorm(x + (x @ w + b)) with prepared (padded/packed) parameters.

    x: [M, D] activations (tokens x model dim). Output dtype follows x (pass bf16
    activations to halve streamed HBM bytes on the memory-bound regime).
    """
    M, D = x.shape
    assert D == params.d, f"x feature dim {D} != prepared dim {params.d}"
    dp = params.dp
    out_dtype = out_dtype or x.dtype
    mm_dtype = params.wp.dtype

    gen = _tpu_generation()
    budget = _vmem_budget_bytes(gen)
    x_isz = jnp.dtype(x.dtype).itemsize
    o_isz = jnp.dtype(out_dtype).itemsize
    w_isz = jnp.dtype(mm_dtype).itemsize

    tm_, tk_, nk = _choose_tiles(M, dp, x_isz, o_isz, w_isz, gen, budget, tm, tk)
    Mp = _round_up(M, tm_)
    nm = Mp // tm_
    pad_m, pad_d = Mp - M, dp - D
    xp = jnp.pad(x, ((0, pad_m), (0, pad_d))) if (pad_m or pad_d) else x

    cost = pl.CostEstimate(
        flops=2 * M * D * D,
        transcendentals=0,
        bytes_accessed=int(M * D * (x_isz + o_isz) + dp * dp * w_isz + 8 * dp * 4),
    )

    def build_and_run(single_buffer_constants):
        const_kw = {"pipeline_mode": pl.Buffered(1)} if single_buffer_constants else {}
        if nk == 1:
            kern = functools.partial(_residual_fused_kernel,
                                     inv_d=1.0 / D, d=D, dp=dp, mm_dtype=mm_dtype)
            grid_spec = pltpu.PrefetchScalarGridSpec(
                num_scalar_prefetch=0,
                grid=(nm,),
                in_specs=[
                    pl.BlockSpec((tm_, dp), lambda i: (i, 0)),             # x: pipelined rows
                    pl.BlockSpec((dp, dp), lambda i: (0, 0), **const_kw),  # weight: resident, 1 buffer
                    pl.BlockSpec((8, dp), lambda i: (0, 0), **const_kw),   # bias/gamma/beta packed
                ],
                out_specs=pl.BlockSpec((tm_, dp), lambda i: (i, 0)),
            )
            dims = ("parallel",)
            args = (xp, params.wp, params.cvec)
        else:
            kern = functools.partial(_residual_ktiled_kernel,
                                     inv_d=1.0 / D, d=D, dp=dp, mm_dtype=mm_dtype)
            grid_spec = pltpu.PrefetchScalarGridSpec(
                num_scalar_prefetch=0,
                grid=(nm, nk),
                in_specs=[
                    pl.BlockSpec((tm_, tk_), lambda i, k: (i, k)),           # x K-chunk for MXU
                    pl.BlockSpec((tk_, dp), lambda i, k: (k, 0)),            # weight K-tile (streamed)
                    pl.BlockSpec((tm_, dp), lambda i, k: (i, 0)),            # full x row for residual
                    pl.BlockSpec((8, dp), lambda i, k: (0, 0), **const_kw),  # bias/gamma/beta packed
                ],
                out_specs=pl.BlockSpec((tm_, dp), lambda i, k: (i, 0)),
                scratch_shapes=[pltpu.VMEM((tm_, dp), jnp.float32)],         # f32 accumulator
            )
            dims = ("parallel", "arbitrary")
            args = (xp, params.wp, xp, params.cvec)

        return pl.pallas_call(
            kern,
            out_shape=jax.ShapeDtypeStruct((Mp, dp), out_dtype),
            grid_spec=grid_spec,
            compiler_params=pltpu.CompilerParams(
                dimension_semantics=dims,
                vmem_limit_bytes=int(budget),      # physical minus headroom (generation-aware)
            ),
            cost_estimate=cost,
        )(*args)

    try:
        out = build_and_run(True)
    except Exception:
        # Fallback if pl.Buffered(1) single-buffering is not supported by this jax version.
        out = build_and_run(False)

    if pad_m or pad_d:
        out = out[:M, :D]
    return out


# ---------------------------------------------------------------------------
# References
# ---------------------------------------------------------------------------

def residual_ref_f32(x, w, b, gamma, beta):
    """Pure-f32 JAX reference (module semantics)."""
    z = x + (x @ w + b)
    mean = jnp.mean(z, axis=-1, keepdims=True)
    var = jnp.mean((z - mean) ** 2, axis=-1, keepdims=True)
    return (z - mean) / jnp.sqrt(var + EPS) * gamma + beta


def residual_ref_mixed(x, w, b, gamma, beta, mm_dtype=jnp.bfloat16):
    """Reference matching the kernel's mixed precision (bf16 matmul, f32 elsewhere)."""
    y = jnp.dot(x.astype(mm_dtype), w.astype(mm_dtype),
                preferred_element_type=jnp.float32) + b
    z = x + y
    mean = jnp.mean(z, axis=-1, keepdims=True)
    var = jnp.mean((z - mean) ** 2, axis=-1, keepdims=True)
    return (z - mean) / jnp.sqrt(var + EPS) * gamma + beta


if __name__ == "__main__":
    batch, seq, dim = 2, 8, 32
    key = jax.random.PRNGKey(0)
    kx, kw, kb = jax.random.split(key, 3)

    # Deterministic synthetic parameters (module __init__ shapes):
    #   layer = Linear(dim, dim): weight [dim, dim], bias [dim]
    #   norm  = LayerNorm(dim):   gamma [dim] (ones), beta [dim] (zeros)
    x = jax.random.normal(kx, (batch, seq, dim), dtype=jnp.float32)
    w_t = jax.random.normal(kw, (dim, dim), dtype=jnp.float32) * 0.1   # stored [in, out]
    b = jax.random.normal(kb, (dim,), dtype=jnp.float32) * 0.1
    gamma = jnp.ones((dim,), dtype=jnp.float32)
    beta = jnp.zeros((dim,), dtype=jnp.float32)

    x2d = x.reshape(batch * seq, dim)

    # Parameter prep (pad + bf16 cast + bias/gamma/beta packing) is done ONCE and reused.
    params = prepare_residual_params(w_t, b, gamma, beta)

    out = jax.block_until_ready(residual_forward(x2d, params))
    assert out.shape == (batch * seq, dim)

    # Tight check vs the mixed-precision reference (same bf16 matmul semantics).
    ref_mixed = residual_ref_mixed(x2d, w_t, b, gamma, beta)
    assert jnp.allclose(out, ref_mixed, atol=1e-4, rtol=1e-4), "mismatch vs bf16-matmul reference"

    # Loose check vs the pure-f32 module reference (bf16 MXU rounding only).
    ref_f32 = residual_ref_f32(x2d, w_t, b, gamma, beta)
    assert jnp.allclose(out, ref_f32, atol=3e-2, rtol=3e-2), "mismatch vs f32 reference"

    # Reshape back to [batch, seq, dim] (PyTorch view).
    _ = out.reshape(batch, seq, dim)

    # bf16 activations in / bf16 out (halves streamed HBM bytes on the mem-bound regime).
    x_bf = x2d.astype(jnp.bfloat16)
    out_bf = jax.block_until_ready(residual_forward(x_bf, params))
    ref_bf = residual_ref_mixed(x_bf.astype(jnp.float32), w_t, b, gamma, beta)
    assert out_bf.dtype == jnp.bfloat16
    assert jnp.allclose(out_bf.astype(jnp.float32), ref_bf, atol=3e-2, rtol=3e-2), \
        "mismatch on bf16-activation path"

    # Exercise the K-tiled (large-D / v7x) fallback path at small scale by forcing tk < Dp,
    # with row padding and a multi-tile token grid.
    dim2 = 512
    k2x, k2w, k2b = jax.random.split(jax.random.PRNGKey(1), 3)
    x2 = jax.random.normal(k2x, (640, dim2), dtype=jnp.float32)
    w2 = jax.random.normal(k2w, (dim2, dim2), dtype=jnp.float32) * 0.05
    b2 = jax.random.normal(k2b, (dim2,), dtype=jnp.float32) * 0.1
    g2 = jnp.ones((dim2,), dtype=jnp.float32)
    bt2 = jnp.zeros((dim2,), dtype=jnp.float32)
    params2 = prepare_residual_params(w2, b2, g2, bt2)
    out2 = jax.block_until_ready(residual_forward(x2, params2, tm=256, tk=256))
    ref2 = residual_ref_mixed(x2, w2, b2, g2, bt2)
    assert out2.shape == (640, dim2)
    assert jnp.allclose(out2, ref2, atol=5e-4, rtol=5e-4), "mismatch vs reference (K-tiled path)"

    print("KERNEL_OK")
</pallas_src>

<mosaic_0001>
module attributes {stable_mosaic.version = 11 : i64} {
  func.func @_residual_fused_kernel(%arg0: i32, %arg1: memref<16x256xf32, #tpu.memory_space<vmem>>, %arg2: memref<256x256xbf16, #tpu.memory_space<vmem>>, %arg3: memref<8x256xf32, #tpu.memory_space<vmem>>, %arg4: memref<16x256xf32, #tpu.memory_space<vmem>>) attributes {dimension_semantics = [#tpu.dimension_semantics<parallel>], iteration_bounds = array<i64: 1>, scalar_prefetch = 0 : i64, scratch_operands = 0 : i64, tpu.core_type = #tpu.core_type<tc>, window_params = [{transform_indices = @transform_0, window_bounds = array<i64: 16, 256>}, {pipeline_mode = #tpu.pipeline_mode<synchronous>, transform_indices = @transform_1, window_bounds = array<i64: 256, 256>}, {pipeline_mode = #tpu.pipeline_mode<synchronous>, transform_indices = @transform_2, window_bounds = array<i64: 8, 256>}, {transform_indices = @transform_3, window_bounds = array<i64: 16, 256>}]} {
    %c0 = arith.constant 0 : index
    %c0_0 = arith.constant 0 : index
    %0 = vector.load %arg1[%c0, %c0_0] : memref<16x256xf32, #tpu.memory_space<vmem>>, vector<16x256xf32>
    %1 = arith.truncf %0 : vector<16x256xf32> to vector<16x256xbf16>
    %c0_1 = arith.constant 0 : index
    %c0_2 = arith.constant 0 : index
    %2 = vector.load %arg2[%c0_1, %c0_2] : memref<256x256xbf16, #tpu.memory_space<vmem>>, vector<256x256xbf16>
    %cst = arith.constant dense<0.000000e+00> : vector<16x256xf32>
    %3 = tpu.matmul %1, %2, %cst {dimension_numbers = #tpu.dot_dimension_numbers<[1], [0], [0], [1], [0, 0, 1, 1], [], []>} : vector<16x256xbf16>, vector<256x256xbf16>, vector<16x256xf32> -> vector<16x256xf32>
    %4 = arith.addf %0, %3 : vector<16x256xf32>
    %c0_3 = arith.constant 0 : index
    %c0_4 = arith.constant 0 : index
    %5 = vector.load %arg3[%c0_3, %c0_4] : memref<8x256xf32, #tpu.memory_space<vmem>>, vector<8x256xf32>
    %6 = vector.extract_strided_slice %5 {offsets = [0, 0], sizes = [1, 256], strides = [1, 1]} : vector<8x256xf32> to vector<1x256xf32>
    %7 = vector.extract_strided_slice %5 {offsets = [1, 0], sizes = [1, 256], strides = [1, 1]} : vector<8x256xf32> to vector<1x256xf32>
    %8 = vector.extract_strided_slice %5 {offsets = [2, 0], sizes = [1, 256], strides = [1, 1]} : vector<8x256xf32> to vector<1x256xf32>
    %9 = vector.broadcast %6 : vector<1x256xf32> to vector<16x256xf32>
    %10 = arith.addf %4, %9 : vector<16x256xf32>
    %cst_5 = arith.constant dense<0.000000e+00> : vector<16xf32>
    %11 = vector.multi_reduction <add>, %10, %cst_5 [1] : vector<16x256xf32> to vector<16xf32>
    %12 = vector.shape_cast %11 : vector<16xf32> to vector<16x1xf32>
    %cst_6 = arith.constant 3.125000e-02 : f32
    %13 = vector.broadcast %cst_6 : f32 to vector<16x1xf32>
    %14 = arith.mulf %12, %13 : vector<16x1xf32>
    %15 = vector.broadcast %14 : vector<16x1xf32> to vector<16x256xf32>
    %16 = arith.subf %10, %15 : vector<16x256xf32>
    %17 = tpu.iota {dimensions = array<i32: 1>} : vector<16x256xi32>
    %c32_i32 = arith.constant 32 : i32
    %18 = vector.broadcast %c32_i32 : i32 to vector<16x256xi32>
    %19 = arith.cmpi slt, %17, %18 : vector<16x256xi32>
    %cst_7 = arith.constant 0.000000e+00 : f32
    %20 = vector.broadcast %cst_7 : f32 to vector<16x256xf32>
    %21 = arith.select %19, %16, %20 : vector<16x256xi1>, vector<16x256xf32>
    %22 = arith.mulf %21, %21 : vector<16x256xf32>
    %cst_8 = arith.constant dense<0.000000e+00> : vector<16xf32>
    %23 = vector.multi_reduction <add>, %22, %cst_8 [1] : vector<16x256xf32> to vector<16xf32>
    %24 = vector.shape_cast %23 : vector<16xf32> to vector<16x1xf32>
    %cst_9 = arith.constant 3.125000e-02 : f32
    %25 = vector.broadcast %cst_9 : f32 to vector<16x1xf32>
    %26 = arith.mulf %24, %25 : vector<16x1xf32>
    %cst_10 = arith.constant 0.000000e+00 : f32
    %27 = vector.broadcast %cst_10 : f32 to vector<16x1xf32>
    %28 = arith.maximumf %26, %27 : vector<16x1xf32>
    %cst_11 = arith.constant 9.99999974E-6 : f32
    %29 = vector.broadcast %cst_11 : f32 to vector<16x1xf32>
    %30 = arith.addf %28, %29 : vector<16x1xf32>
    %31 = math.rsqrt %30 : vector<16x1xf32>
    %32 = vector.broadcast %31 : vector<16x1xf32> to vector<16x256xf32>
    %33 = arith.mulf %21, %32 : vector<16x256xf32>
    %34 = vector.broadcast %7 : vector<1x256xf32> to vector<16x256xf32>
    %35 = arith.mulf %33, %34 : vector<16x256xf32>
    %36 = vector.broadcast %8 : vector<1x256xf32> to vector<16x256xf32>
    %37 = arith.addf %35, %36 : vector<16x256xf32>
    %c0_12 = arith.constant 0 : index
    %c0_13 = arith.constant 0 : index
    %38 = vector.load %arg4[%c0_12, %c0_13] : memref<16x256xf32, #tpu.memory_space<vmem>>, vector<16x256xf32>
    tpu.vector_store %arg4[%c0_12, %c0_13], %37 {strides = array<i32>} : memref<16x256xf32, #tpu.memory_space<vmem>>, vector<16x256xf32>,
    return
  }
  func.func @transform_0(%arg0: i32) -> (i32, i32) {
    %c0_i32 = arith.constant 0 : i32
    %c0_i32_0 = arith.constant 0 : i32
    return %arg0, %c0_i32 : i32, i32
  }
  func.func @transform_1(%arg0: i32) -> (i32, i32) {
    %c0_i32 = arith.constant 0 : i32
    %c0_i32_0 = arith.constant 0 : i32
    %c0_i32_1 = arith.constant 0 : i32
    return %c0_i32, %c0_i32_0 : i32, i32
  }
  func.func @transform_2(%arg0: i32) -> (i32, i32) {
    %c0_i32 = arith.constant 0 : i32
    %c0_i32_0 = arith.constant 0 : i32
    %c0_i32_1 = arith.constant 0 : i32
    return %c0_i32, %c0_i32_0 : i32, i32
  }
  func.func @transform_3(%arg0: i32) -> (i32, i32) {
    %c0_i32 = arith.constant 0 : i32
    %c0_i32_0 = arith.constant 0 : i32
    return %arg0, %c0_i32 : i32, i32
  }
}

module attributes {stable_mosaic.version = 11 : i64} {
  func.func @_residual_fused_kernel(%arg0: i32, %arg1: memref<16x256xf32, #tpu.memory_space<vmem>>, %arg2: memref<256x256xbf16, #tpu.memory_space<vmem>>, %arg3: memref<8x256xf32, #tpu.memory_space<vmem>>, %arg4: memref<16x256xf32, #tpu.memory_space<vmem>>) attributes {dimension_semantics = [#tpu.dimension_semantics<parallel>], iteration_bounds = array<i64: 1>, scalar_prefetch = 0 : i64, scratch_operands = 0 : i64, tpu.core_type = #tpu.core_type<tc>, window_params = [{transform_indices = @transform_0, window_bounds = array<i64: 16, 256>}, {pipeline_mode = #tpu.pipeline_mode<synchronous>, transform_indices = @transform_1, window_bounds = array<i64: 256, 256>}, {pipeline_mode = #tpu.pipeline_mode<synchronous>, transform_indices = @transform_2, window_bounds = array<i64: 8, 256>}, {transform_indices = @transform_3, window_bounds = array<i64: 16, 256>}]} {
    %c0 = arith.constant 0 : index
    %c0_0 = arith.constant 0 : index
    %0 = vector.load %arg1[%c0, %c0_0] : memref<16x256xf32, #tpu.memory_space<vmem>>, vector<16x256xf32>
    %1 = arith.truncf %0 : vector<16x256xf32> to vector<16x256xbf16>
    %c0_1 = arith.constant 0 : index
    %c0_2 = arith.constant 0 : index
    %2 = vector.load %arg2[%c0_1, %c0_2] : memref<256x256xbf16, #tpu.memory_space<vmem>>, vector<256x256xbf16>
    %cst = arith.constant dense<0.000000e+00> : vector<16x256xf32>
    %3 = tpu.matmul %1, %2, %cst {dimension_numbers = #tpu.dot_dimension_numbers<[1], [0], [0], [1], [0, 0, 1, 1], [], []>} : vector<16x256xbf16>, vector<256x256xbf16>, vector<16x256xf32> -> vector<16x256xf32>
    %4 = arith.addf %0, %3 : vector<16x256xf32>
    %c0_3 = arith.constant 0 : index
    %c0_4 = arith.constant 0 : index
    %5 = vector.load %arg3[%c0_3, %c0_4] : memref<8x256xf32, #tpu.memory_space<vmem>>, vector<8x256xf32>
    %6 = vector.extract_strided_slice %5 {offsets = [0, 0], sizes = [1, 256], strides = [1, 1]} : vector<8x256xf32> to vector<1x256xf32>
    %7 = vector.extract_strided_slice %5 {offsets = [1, 0], sizes = [1, 256], strides = [1, 1]} : vector<8x256xf32> to vector<1x256xf32>
    %8 = vector.extract_strided_slice %5 {offsets = [2, 0], sizes = [1, 256], strides = [1, 1]} : vector<8x256xf32> to vector<1x256xf32>
    %9 = vector.broadcast %6 : vector<1x256xf32> to vector<16x256xf32>
    %10 = arith.addf %4, %9 : vector<16x256xf32>
    %cst_5 = arith.constant dense<0.000000e+00> : vector<16xf32>
    %11 = vector.multi_reduction <add>, %10, %cst_5 [1] : vector<16x256xf32> to vector<16xf32>
    %12 = vector.shape_cast %11 : vector<16xf32> to vector<16x1xf32>
    %cst_6 = arith.constant 3.125000e-02 : f32
    %13 = vector.broadcast %cst_6 : f32 to vector<16x1xf32>
    %14 = arith.mulf %12, %13 : vector<16x1xf32>
    %15 = vector.broadcast %14 : vector<16x1xf32> to vector<16x256xf32>
    %16 = arith.subf %10, %15 : vector<16x256xf32>
    %17 = tpu.iota {dimensions = array<i32: 1>} : vector<16x256xi32>
    %c32_i32 = arith.constant 32 : i32
    %18 = vector.broadcast %c32_i32 : i32 to vector<16x256xi32>
    %19 = arith.cmpi slt, %17, %18 : vector<16x256xi32>
    %cst_7 = arith.constant 0.000000e+00 : f32
    %20 = vector.broadcast %cst_7 : f32 to vector<16x256xf32>
    %21 = arith.select %19, %16, %20 : vector<16x256xi1>, vector<16x256xf32>
    %22 = arith.mulf %21, %21 : vector<16x256xf32>
    %cst_8 = arith.constant dense<0.000000e+00> : vector<16xf32>
    %23 = vector.multi_reduction <add>, %22, %cst_8 [1] : vector<16x256xf32> to vector<16xf32>
    %24 = vector.shape_cast %23 : vector<16xf32> to vector<16x1xf32>
    %cst_9 = arith.constant 3.125000e-02 : f32
    %25 = vector.broadcast %cst_9 : f32 to vector<16x1xf32>
    %26 = arith.mulf %24, %25 : vector<16x1xf32>
    %cst_10 = arith.constant 0.000000e+00 : f32
    %27 = vector.broadcast %cst_10 : f32 to vector<16x1xf32>
    %28 = arith.maximumf %26, %27 : vector<16x1xf32>
    %cst_11 = arith.constant 9.99999974E-6 : f32
    %29 = vector.broadcast %cst_11 : f32 to vector<16x1xf32>
    %30 = arith.addf %28, %29 : vector<16x1xf32>
    %31 = math.rsqrt %30 : vector<16x1xf32>
    %32 = vector.broadcast %31 : vector<16x1xf32> to vector<16x256xf32>
    %33 = arith.mulf %21, %32 : vector<16x256xf32>
    %34 = vector.broadcast %7 : vector<1x256xf32> to vector<16x256xf32>
    %35 = arith.mulf %33, %34 : vector<16x256xf32>
    %36 = vector.broadcast %8 : vector<1x256xf32> to vector<16x256xf32>
    %37 = arith.addf %35, %36 : vector<16x256xf32>
    %c0_12 = arith.constant 0 : index
    %c0_13 = arith.constant 0 : index
    %38 = vector.load %arg4[%c0_12, %c0_13] : memref<16x256xf32, #tpu.memory_space<vmem>>, vector<16x256xf32>
    tpu.vector_store %arg4[%c0_12, %c0_13], %37 {strides = array<i32>} : memref<16x256xf32, #tpu.memory_space<vmem>>, vector<16x256xf32>,
    return
  }
  func.func @transform_0(%arg0: i32) -> (i32, i32) {
    %c0_i32 = arith.constant 0 : i32
    %c0_i32_0 = arith.constant 0 : i32
    return %arg0, %c0_i32 : i32, i32
  }
  func.func @transform_1(%arg0: i32) -> (i32, i32) {
    %c0_i32 = arith.constant 0 : i32
    %c0_i32_0 = arith.constant 0 : i32
    %c0_i32_1 = arith.constant 0 : i32
    return %c0_i32, %c0_i32_0 : i32, i32
  }
  func.func @transform_2(%arg0: i32) -> (i32, i32) {
    %c0_i32 = arith.constant 0 : i32
    %c0_i32_0 = arith.constant 0 : i32
    %c0_i32_1 = arith.constant 0 : i32
    return %c0_i32, %c0_i32_0 : i32, i32
  }
  func.func @transform_3(%arg0: i32) -> (i32, i32) {
    %c0_i32 = arith.constant 0 : i32
    %c0_i32_0 = arith.constant 0 : i32
    return %arg0, %c0_i32 : i32, i32
  }
}

</mosaic_0001>

<bundles_post_ra>
// kernel: tpu_custom_call.1
= control target key start
LH: loop header
LB: loop body
LE: loop exit
PB: predicated region body
PF: predicated region fallthrough
CT: control target
= control target key end

     0   :  { %8 = vsyncpa [#allocation3], 0  ;;  %s634_s0 = inlined_call_operand.hbm [shape: f32[16,256], index: 0, kind: input, shape index: {}]   ;;  %s635_s1 = inlined_call_operand.hbm [shape: bf16[256,256], index: 1, kind: input, shape index: {}]   ;;  %s636_s2 = inlined_call_operand.hbm [shape: f32[8,256], index: 2, kind: input, shape index: {}]   ;;  %s637_s3 = inlined_call_operand.hbm [shape: f32[16,256], index: 3, kind: output, shape index: {}]  }
   0x1   :  { %9 = vsyncpa [#allocation6], 0 }
   0x2   :  { %10 = vsyncpa [#allocation4], 0  ;;  %s580_s12 = smov [#allocation5]  }
   0x3   :  { %s28_s13 = sshll.u32 %s580_s12, 4  ;;  %s29_s13 = int_to_ptr.vmem [resolvable:$true] %s28_s13 }
   0x4   :  { %s502_s14 = scalar_lea.vmem %s29_s13, 4096  ;;  %p507_p1 = scmp.lt.s32.totalorder %s29_s13, %s29_s13 }
   0x5   :  { %p503_p0 = scmp.ne.s32.totalorder %s29_s13, %s502_s14  ;;  %p508_p2 = scmp.lt.s32.totalorder %s502_s14, %s502_s14 }
   0x7   :  { %p509_p3 = por %p508_p2, %p507_p1 }
   0x9   :  { %p510_p4 = pnand %p509_p3, %p503_p0 }
   0xb   :  { %513 = shalt.err (!%p510_p4)
}
   0xc   :  { %s581_s15 = smov 128   ;;  %s582_s16 = smov 8  }
   0xd   :  { %34 = dma.hbm_to_vmem [thread:$0]  %s635_s1, 4096, %s29_s13, [#allocation6], %s581_s15, %s581_s15, %s582_s16  }
   0xe   :  { %s583_s19 = smov [#allocation2]  }
   0xf   :  { %s16_s20 = sshll.u32 %s583_s19, 4  ;;  %s17_s20 = int_to_ptr.vmem [resolvable:$true] %s16_s20 }
  0x10   :  { %s522_s21 = scalar_lea.vmem %s17_s20, 512  ;;  %p527_p6 = scmp.lt.s32.totalorder %s17_s20, %s17_s20 }
  0x11   :  { %p523_p5 = scmp.ne.s32.totalorder %s17_s20, %s522_s21  ;;  %p528_p7 = scmp.lt.s32.totalorder %s522_s21, %s522_s21 }
  0x13   :  { %p529_p8 = por %p528_p7, %p527_p6 }
  0x15   :  { %p530_p9 = pnand %p529_p8, %p523_p5 }
  0x17   :  { %533 = shalt.err (!%p530_p9)
}
  0x18   :  { %s584_s22 = smov 256   ;;  %s585_s23 = smov 16  }
  0x19   :  { %22 = dma.hbm_to_vmem [thread:$0]  %s634_s0, 512, %s17_s20, [#allocation3], %s584_s22, %s584_s22, %s585_s23  }
  0x1a   :  { %s586_s1 = smov [#allocation7]  }
  0x1b   :  { %s41_s26 = sshll.u32 %s586_s1, 4  ;;  %s42_s26 = int_to_ptr.vmem [resolvable:$true] %s41_s26 }
  0x1c   :  { %s542_s27 = scalar_lea.vmem %s42_s26, 256  ;;  %p547_p11 = scmp.lt.s32.totalorder %s42_s26, %s42_s26 }
  0x1d   :  { %p543_p10 = scmp.ne.s32.totalorder %s42_s26, %s542_s27  ;;  %p548_p12 = scmp.lt.s32.totalorder %s542_s27, %s542_s27 }
  0x1f   :  { %p549_p13 = por %p548_p12, %p547_p11 }
  0x21   :  { %p550_p0 = pnand %p549_p13, %p543_p10 }
  0x23   :  { %553 = shalt.err (!%p550_p0)
}
  0x24   :  { %44 = dma.hbm_to_vmem [thread:$0]  %s636_s2, 256, %s42_s26, [#allocation6]  }
  0x25   :  { %574 = dma.done.wait [#allocation3], 512  }
  0x26   :  { %575 = vsyncadd [#allocation3], 4294966784 }
  0x27   :  { %576 = dma.done.wait [#allocation6], 4352  }
  0x28   :  { %577 = vsyncadd [#allocation6], 4294962944  ;;  %v442_v0 = vld [vmem:[#allocation5 + $0x74] ss:$8 sps:$4 sm:$0xff]   ;;  %v444_v1 = vld [vmem:[#allocation5 + $0x70] ss:$8 sps:$4 sm:$0xff]   ;;  %v301_v38 = vlaneseq }
  0x29   :  { %252 = vmatprep.subr.bf16.mxu0 %v442_v0  ;;  %v445_v2 = vld [vmem:[#allocation5 + $0x64] ss:$8 sps:$4 sm:$0xff]   ;;  %v447_v3 = vld [vmem:[#allocation5 + $0x60] ss:$8 sps:$4 sm:$0xff]   ;;  %v448_v4 = vld [vmem:[#allocation5 + $0x54] ss:$8 sps:$4 sm:$0xff]  }
  0x2a   :  { %253 = vmatpush1.bf16.msra.mxu0 %v444_v1  ;;  %v450_v5 = vld [vmem:[#allocation5 + $0x50] ss:$8 sps:$4 sm:$0xff]   ;;  %v451_v6 = vld [vmem:[#allocation5 + $0x44] ss:$8 sps:$4 sm:$0xff]   ;;  %v453_v7 = vld [vmem:[#allocation5 + $0x40] ss:$8 sps:$4 sm:$0xff]  }
  0x2b   :  { %254 = vmatprep.subr.bf16.mxu0 %v445_v2  ;;  %v454_v8 = vld [vmem:[#allocation5 + $0x34] ss:$8 sps:$4 sm:$0xff]   ;;  %v456_v9 = vld [vmem:[#allocation5 + $0x30] ss:$8 sps:$4 sm:$0xff]   ;;  %v457_v10 = vld [vmem:[#allocation5 + $0x24] ss:$8 sps:$4 sm:$0xff]  }
  0x2c   :  { %v459_v11 = vld [vmem:[#allocation5 + $0x20] ss:$8 sps:$4 sm:$0xff]   ;;  %v460_v12 = vld [vmem:[#allocation5 + $0x14] ss:$8 sps:$4 sm:$0xff]   ;;  %v462_v16 = vld [vmem:[#allocation5 + $0x10] ss:$8 sps:$4 sm:$0xff]  }
  0x2d   :  { %v620_v13 = vld [vmem:[#allocation2 + $0x8] sm:$0xff]  ;;  %v622_v14 = vld [vmem:[#allocation2 + $0x18] sm:$0xff]  ;;  %v54_v35 = vld [vmem:[#allocation2] sm:$0xff]  ;;  %v302_v39 = vshrl.u32 %v301_v38, 7  ;;  %v326_v1 = vand.u32 127, %v301_v38  ;;  %s587_s0 = smov [#allocation8]  }
  0x2e   :  { %255 = vmatpush1.bf16.msra.mxu0 %v447_v3  ;;  %v59_v15 = vpack.c.bf16 %v622_v14, %v620_v13  ;;  %v463_v17 = vld [vmem:[#allocation5 + $0x4] ss:$8 sps:$4 sm:$0xff]   ;;  %v465_v18 = vld [vmem:[#allocation5] ss:$8 sps:$4 sm:$0xff]   ;;  %v466_v19 = vld [vmem:[#allocation5 + $0xf4] ss:$8 sps:$4 sm:$0xff]  }
  0x2f   :  { %256 = vmatprep.subr.bf16.mxu0 %v448_v4  ;;  %v468_v20 = vld [vmem:[#allocation5 + $0xf0] ss:$8 sps:$4 sm:$0xff]   ;;  %v469_v21 = vld [vmem:[#allocation5 + $0xe4] ss:$8 sps:$4 sm:$0xff]   ;;  %v471_v22 = vld [vmem:[#allocation5 + $0xe0] ss:$8 sps:$4 sm:$0xff]  }
  0x30   :  { %284 = vmatprep.mubr.bf16.mxu0 %v59_v15  ;;  %v472_v23 = vld [vmem:[#allocation5 + $0xd4] ss:$8 sps:$4 sm:$0xff]   ;;  %v474_v24 = vld [vmem:[#allocation5 + $0xd0] ss:$8 sps:$4 sm:$0xff]   ;;  %v475_v25 = vld [vmem:[#allocation5 + $0xc4] ss:$8 sps:$4 sm:$0xff]  }
  0x31   :  { %v477_v26 = vld [vmem:[#allocation5 + $0xc0] ss:$8 sps:$4 sm:$0xff]   ;;  %v478_v27 = vld [vmem:[#allocation5 + $0xb4] ss:$8 sps:$4 sm:$0xff]   ;;  %v480_v28 = vld [vmem:[#allocation5 + $0xb0] ss:$8 sps:$4 sm:$0xff]  }
  0x32   :  { %257 = vmatpush1.bf16.msra.mxu0 %v450_v5  ;;  %v481_v29 = vld [vmem:[#allocation5 + $0xa4] ss:$8 sps:$4 sm:$0xff]   ;;  %v483_v30 = vld [vmem:[#allocation5 + $0xa0] ss:$8 sps:$4 sm:$0xff]   ;;  %v484_v31 = vld [vmem:[#allocation5 + $0x94] ss:$8 sps:$4 sm:$0xff]  }
  0x33   :  { %258 = vmatprep.subr.bf16.mxu0 %v451_v6  ;;  %v486_v32 = vld [vmem:[#allocation5 + $0x90] ss:$8 sps:$4 sm:$0xff]   ;;  %v487_v33 = vld [vmem:[#allocation5 + $0x84] ss:$8 sps:$4 sm:$0xff]   ;;  %v489_v34 = vld [vmem:[#allocation5 + $0x80] ss:$8 sps:$4 sm:$0xff]  }
  0x34   :  { %v56_v36 = vld [vmem:[#allocation2 + $0x10] sm:$0xff]  ;;  %v358_v40 = vsub.s32 1, %v302_v39  ;;  %v370_v41 = vsub.s32 2, %v302_v39  ;;  %v299_v42 = vld [vmem:[#allocation7] sm:$0xff]  ;;  %v300_v43 = vld [vmem:[#allocation7 + $0x8] sm:$0xff]  ;;  %v303_v48 = vsub.s32 0, %v302_v39 }
  0x35   :  { %v58_v37 = vpack.c.bf16 %v56_v36, %v54_v35  ;;  %vm328_vm0 = vcmp.lt.s32.totalorder %v326_v1, 32  ;;  %s389_s2 = sshll.u32 %s587_s0, 4  ;;  %s390_s2 = int_to_ptr.vmem [resolvable:$true] %s389_s2 }
  0x36   :  { %259 = vmatpush1.bf16.msra.mxu0 %v453_v7  ;;  %v359_v44 = vrot.slane %v299_v42, %v358_v40  ;;  %v371_v45 = vrot.slane %v299_v42, %v370_v41  ;;  %v363_v46 = vrot.slane %v300_v43, %v358_v40  ;;  %v375_v47 = vrot.slane %v300_v43, %v370_v41  ;;  %s554_s30 = scalar_lea.vmem %s390_s2, 512  ;;  %p559_p2 = scmp.lt.s32.totalorder %s390_s2, %s390_s2 }
  0x37   :  { %260 = vmatprep.subr.bf16.mxu0 %v454_v8  ;;  %v304_v51 = vrot.slane %v299_v42, %v303_v48  ;;  %v308_v52 = vrot.slane %v300_v43, %v303_v48  ;;  %p555_p1 = scmp.ne.s32.totalorder %s390_s2, %s554_s30  ;;  %p560_p3 = scmp.lt.s32.totalorder %s554_s30, %s554_s30 }
  0x39   :  { %p561_p4 = por %p560_p3, %p559_p2 }
  0x3a   :  { %261 = vmatpush1.bf16.msra.mxu0 %v456_v9 }
  0x3b   :  { %262 = vmatprep.subr.bf16.mxu0 %v457_v10  ;;  %p562_p5 = pnand %p561_p4, %p555_p1 }
  0x3e   :  { %263 = vmatpush1.bf16.msra.mxu0 %v459_v11 }
  0x3f   :  { %264 = vmatprep.subr.bf16.mxu0 %v460_v12 }
  0x42   :  { %265 = vmatpush1.bf16.msra.mxu0 %v462_v16 }
  0x43   :  { %266 = vmatprep.subr.bf16.mxu0 %v463_v17 }
  0x46   :  { %267 = vmatpush1.bf16.msra.mxu0 %v465_v18 }
  0x47   :  { %268 = vmatprep.subr.bf16.mxu0 %v466_v19 }
  0x4a   :  { %269 = vmatpush2.bf16.msra.mxu0 %v468_v20 }
  0x4b   :  { %270 = vmatprep.subr.bf16.mxu0 %v469_v21 }
  0x4e   :  { %271 = vmatpush2.bf16.msra.mxu0 %v471_v22 }
  0x4f   :  { %272 = vmatprep.subr.bf16.mxu0 %v472_v23 }
  0x52   :  { %273 = vmatpush2.bf16.msra.mxu0 %v474_v24 }
  0x53   :  { %274 = vmatprep.subr.bf16.mxu0 %v475_v25 }
  0x56   :  { %275 = vmatpush2.bf16.msra.mxu0 %v477_v26 }
  0x57   :  { %276 = vmatprep.subr.bf16.mxu0 %v478_v27 }
  0x5a   :  { %277 = vmatpush2.bf16.msra.mxu0 %v480_v28 }
  0x5b   :  { %278 = vmatprep.subr.bf16.mxu0 %v481_v29 }
  0x5e   :  { %279 = vmatpush2.bf16.msra.mxu0 %v483_v30 }
  0x5f   :  { %280 = vmatprep.subr.bf16.mxu0 %v484_v31 }
  0x62   :  { %281 = vmatpush2.bf16.msra.mxu0 %v486_v32 }
  0x63   :  { %282 = vmatprep.subr.bf16.mxu0 %v487_v33 }
  0x66   :  { %283 = vmatpush2.bf16.msra.mxu0 %v489_v34 }
  0x69   :  { %285 = vmatmul.mubr.bf16.vlgmr.msra.gmra.mxu0 %v58_v37 }
 0x129   :  { %v286_v49 = vpop.f32.mrf.mxu0 }
 0x12a   :  { %v295_v50 = vadd.f32 %v286_v49, %v54_v35 }
 0x12b   :  { %v288_v53 = vpop.f32.mrf.mxu0 }
 0x12c   :  { %v296_v54 = vadd.f32 %v288_v53, %v620_v13  ;;  %v309_v57 = vadd.f32 %v304_v51, %v295_v50 }
 0x12d   :  { %v290_v55 = vpop.f32.mrf.mxu0 }
 0x12e   :  { %v297_v56 = vadd.f32 %v290_v55, %v56_v36  ;;  %v310_v58 = vadd.f32 %v308_v52, %v296_v54 }
 0x12f   :  { %v292_v59 = vpop.f32.mrf.mxu0 }
 0x130   :  { %v298_v60 = vadd.f32 %v292_v59, %v622_v14  ;;  %v313_v61 = vadd.f32 %v310_v58, %v309_v57  ;;  %v311_v62 = vadd.f32 %v304_v51, %v297_v56 }
 0x132   :  { %v312_v63 = vadd.f32 %v308_v52, %v298_v60  ;;  %314 = vadd.xlane.f32.xlu0 %v313_v61 }
 0x134   :  { %v316_v0 = vadd.f32 %v312_v63, %v311_v62 }
 0x136   :  { %317 = vadd.xlane.f32.xlu0 %v316_v0 }
 0x1bb   :  { %v315_v2 = vpop.xlane.xlu0 %314 }
 0x1bc   :  { %v319_v3 = vmul.f32 0.03125, %v315_v2 }
 0x1be   :  { %v321_v4 = vsub.f32 %v309_v57, %v319_v3 }
 0x1bf   :  { %v318_v5 = vpop.xlane.xlu0 %317 }
 0x1c0   :  { %v320_v6 = vmul.f32 0.03125, %v318_v5  ;;  %v330_v7 = vsel %vm328_vm0, %v321_v4, 0.0 }
 0x1c1   :  { %v334_v8 = vmul.f32 %v330_v7, %v330_v7 }
 0x1c2   :  { %v323_v9 = vsub.f32 %v311_v62, %v320_v6 }
 0x1c3   :  { %339 = vadd.xlane.f32.xlu1 %v334_v8 }
 0x1c4   :  { %v332_v10 = vsel %vm328_vm0, %v323_v9, 0.0 }
 0x1c5   :  { %v336_v11 = vmul.f32 %v332_v10, %v332_v10 }
 0x1c7   :  { %342 = vadd.xlane.f32.xlu1 %v336_v11 }
 0x24c   :  { %v340_v12 = vpop.xlane.xlu1 %339 }
 0x24d   :  { %v344_v13 = vmul.f32 0.03125, %v340_v12 }
 0x24f   :  { %v346_v14 = vmax.f32 %v344_v13, 0.0 }
 0x250   :  { %v343_v15 = vpop.xlane.xlu1 %342 }
 0x251   :  { %v348_v16 = vadd.f32 1e-05, %v346_v14  ;;  %v345_v17 = vmul.f32 0.03125, %v343_v15 }
 0x253   :  { %490 = vrsqrt.f32 %v348_v16  ;;  %v347_v18 = vmax.f32 %v345_v17, 0.0 }
 0x255   :  { %v349_v19 = vadd.f32 1e-05, %v347_v18 }
 0x257   :  { %492 = vrsqrt.f32 %v349_v19 }
 0x260   :  { %v491_v20 = vpop.eup %490 }
 0x261   :  { %v352_v21 = vmul.f32 %v491_v20, %v330_v7  ;;  %v353_v22 = vmul.f32 0.0, %v491_v20 }
 0x263   :  { %v364_v23 = vmul.f32 %v359_v44, %v352_v21  ;;  %v365_v24 = vmul.f32 %v363_v46, %v353_v22 }
 0x264   :  { %v493_v25 = vpop.eup %492 }
 0x265   :  { %v354_v26 = vmul.f32 %v493_v25, %v332_v10  ;;  %v355_v27 = vmul.f32 0.0, %v493_v25  ;;  %v376_v28 = vadd.f32 %v371_v45, %v364_v23  ;;  %v377_v29 = vadd.f32 %v375_v47, %v365_v24 }
 0x267   :  { %v366_v30 = vmul.f32 %v359_v44, %v354_v26  ;;  %v367_v31 = vmul.f32 %v363_v46, %v355_v27  ;;  %380 = vst [vmem:[#allocation8] sm:$0xff] %v376_v28  ;;  %381 = vst [vmem:[#allocation8 + $0x8] sm:$0xff] %v377_v29 }
 0x269   :  { %v378_v32 = vadd.f32 %v371_v45, %v366_v30  ;;  %v379_v33 = vadd.f32 %v375_v47, %v367_v31 }
 0x26b   :  { %382 = vst [vmem:[#allocation8 + $0x10] sm:$0xff] %v378_v32  ;;  %383 = vst [vmem:[#allocation8 + $0x18] sm:$0xff] %v379_v33 }
 0x26c   :  { %565 = shalt.err (!%p562_p5)
}
 0x26d   :  { %395 = dma.vmem_to_hbm [thread:$0]  %s390_s2, 512, %s637_s3, [#allocation4], %s584_s22, %s584_s22, %s585_s23  }
 0x26e   :  { %578 = dma.done.wait [#allocation4], 512  }
 0x26f   :  { %579 = vsyncadd [#allocation4], 4294966784 }
 0x270   :  { %399 = vsyncpa [#allocation3], 1 }
 0x271   :  { %400 = vsyncpa [#allocation6], 1 }
 0x272   :  { %401 = vsyncpa [#allocation4], 1 }

// kernel: tpu_custom_call.1
= control target key start
LH: loop header
LB: loop body
LE: loop exit
PB: predicated region body
PF: predicated region fallthrough
CT: control target
= control target key end

     0   :  { %8 = vsyncpa [#allocation3], 0  ;;  %s634_s0 = inlined_call_operand.hbm [shape: f32[16,256], index: 0, kind: input, shape index: {}]   ;;  %s635_s1 = inlined_call_operand.hbm [shape: bf16[256,256], index: 1, kind: input, shape index: {}]   ;;  %s636_s2 = inlined_call_operand.hbm [shape: f32[8,256], index: 2, kind: input, shape index: {}]   ;;  %s637_s3 = inlined_call_operand.hbm [shape: f32[16,256], index: 3, kind: output, shape index: {}]  }
   0x1   :  { %9 = vsyncpa [#allocation6], 0 }
   0x2   :  { %10 = vsyncpa [#allocation4], 0  ;;  %s580_s12 = smov [#allocation5]  }
   0x3   :  { %s28_s13 = sshll.u32 %s580_s12, 4  ;;  %s29_s13 = int_to_ptr.vmem [resolvable:$true] %s28_s13 }
   0x4   :  { %s502_s14 = scalar_lea.vmem %s29_s13, 4096  ;;  %p507_p1 = scmp.lt.s32.totalorder %s29_s13, %s29_s13 }
   0x5   :  { %p503_p0 = scmp.ne.s32.totalorder %s29_s13, %s502_s14  ;;  %p508_p2 = scmp.lt.s32.totalorder %s502_s14, %s502_s14 }
   0x7   :  { %p509_p3 = por %p508_p2, %p507_p1 }
   0x9   :  { %p510_p4 = pnand %p509_p3, %p503_p0 }
   0xb   :  { %513 = shalt.err (!%p510_p4)
}
   0xc   :  { %s581_s15 = smov 128   ;;  %s582_s16 = smov 8  }
   0xd   :  { %34 = dma.hbm_to_vmem [thread:$0]  %s635_s1, 4096, %s29_s13, [#allocation6], %s581_s15, %s581_s15, %s582_s16  }
   0xe   :  { %s583_s19 = smov [#allocation2]  }
   0xf   :  { %s16_s20 = sshll.u32 %s583_s19, 4  ;;  %s17_s20 = int_to_ptr.vmem [resolvable:$true] %s16_s20 }
  0x10   :  { %s522_s21 = scalar_lea.vmem %s17_s20, 512  ;;  %p527_p6 = scmp.lt.s32.totalorder %s17_s20, %s17_s20 }
  0x11   :  { %p523_p5 = scmp.ne.s32.totalorder %s17_s20, %s522_s21  ;;  %p528_p7 = scmp.lt.s32.totalorder %s522_s21, %s522_s21 }
  0x13   :  { %p529_p8 = por %p528_p7, %p527_p6 }
  0x15   :  { %p530_p9 = pnand %p529_p8, %p523_p5 }
  0x17   :  { %533 = shalt.err (!%p530_p9)
}
  0x18   :  { %s584_s22 = smov 256   ;;  %s585_s23 = smov 16  }
  0x19   :  { %22 = dma.hbm_to_vmem [thread:$0]  %s634_s0, 512, %s17_s20, [#allocation3], %s584_s22, %s584_s22, %s585_s23  }
  0x1a   :  { %s586_s1 = smov [#allocation7]  }
  0x1b   :  { %s41_s26 = sshll.u32 %s586_s1, 4  ;;  %s42_s26 = int_to_ptr.vmem [resolvable:$true] %s41_s26 }
  0x1c   :  { %s542_s27 = scalar_lea.vmem %s42_s26, 256  ;;  %p547_p11 = scmp.lt.s32.totalorder %s42_s26, %s42_s26 }
  0x1d   :  { %p543_p10 = scmp.ne.s32.totalorder %s42_s26, %s542_s27  ;;  %p548_p12 = scmp.lt.s32.totalorder %s542_s27, %s542_s27 }
  0x1f   :  { %p549_p13 = por %p548_p12, %p547_p11 }
  0x21   :  { %p550_p0 = pnand %p549_p13, %p543_p10 }
  0x23   :  { %553 = shalt.err (!%p550_p0)
}
  0x24   :  { %44 = dma.hbm_to_vmem [thread:$0]  %s636_s2, 256, %s42_s26, [#allocation6]  }
  0x25   :  { %574 = dma.done.wait [#allocation3], 512  }
  0x26   :  { %575 = vsyncadd [#allocation3], 4294966784 }
  0x27   :  { %576 = dma.done.wait [#allocation6], 4352  }
  0x28   :  { %577 = vsyncadd [#allocation6], 4294962944  ;;  %v442_v0 = vld [vmem:[#allocation5 + $0x74] ss:$8 sps:$4 sm:$0xff]   ;;  %v444_v1 = vld [vmem:[#allocation5 + $0x70] ss:$8 sps:$4 sm:$0xff]   ;;  %v301_v38 = vlaneseq }
  0x29   :  { %252 = vmatprep.subr.bf16.mxu0 %v442_v0  ;;  %v445_v2 = vld [vmem:[#allocation5 + $0x64] ss:$8 sps:$4 sm:$0xff]   ;;  %v447_v3 = vld [vmem:[#allocation5 + $0x60] ss:$8 sps:$4 sm:$0xff]   ;;  %v448_v4 = vld [vmem:[#allocation5 + $0x54] ss:$8 sps:$4 sm:$0xff]  }
  0x2a   :  { %253 = vmatpush1.bf16.msra.mxu0 %v444_v1  ;;  %v450_v5 = vld [vmem:[#allocation5 + $0x50] ss:$8 sps:$4 sm:$0xff]   ;;  %v451_v6 = vld [vmem:[#allocation5 + $0x44] ss:$8 sps:$4 sm:$0xff]   ;;  %v453_v7 = vld [vmem:[#allocation5 + $0x40] ss:$8 sps:$4 sm:$0xff]  }
  0x2b   :  { %254 = vmatprep.subr.bf16.mxu0 %v445_v2  ;;  %v454_v8 = vld [vmem:[#allocation5 + $0x34] ss:$8 sps:$4 sm:$0xff]   ;;  %v456_v9 = vld [vmem:[#allocation5 + $0x30] ss:$8 sps:$4 sm:$0xff]   ;;  %v457_v10 = vld [vmem:[#allocation5 + $0x24] ss:$8 sps:$4 sm:$0xff]  }
  0x2c   :  { %v459_v11 = vld [vmem:[#allocation5 + $0x20] ss:$8 sps:$4 sm:$0xff]   ;;  %v460_v12 = vld [vmem:[#allocation5 + $0x14] ss:$8 sps:$4 sm:$0xff]   ;;  %v462_v16 = vld [vmem:[#allocation5 + $0x10] ss:$8 sps:$4 sm:$0xff]  }
  0x2d   :  { %v620_v13 = vld [vmem:[#allocation2 + $0x8] sm:$0xff]  ;;  %v622_v14 = vld [vmem:[#allocation2 + $0x18] sm:$0xff]  ;;  %v54_v35 = vld [vmem:[#allocation2] sm:$0xff]  ;;  %v302_v39 = vshrl.u32 %v301_v38, 7  ;;  %v326_v1 = vand.u32 127, %v301_v38  ;;  %s587_s0 = smov [#allocation8]  }
  0x2e   :  { %255 = vmatpush1.bf16.msra.mxu0 %v447_v3  ;;  %v59_v15 = vpack.c.bf16 %v622_v14, %v620_v13  ;;  %v463_v17 = vld [vmem:[#allocation5 + $0x4] ss:$8 sps:$4 sm:$0xff]   ;;  %v465_v18 = vld [vmem:[#allocation5] ss:$8 sps:$4 sm:$0xff]   ;;  %v466_v19 = vld [vmem:[#allocation5 + $0xf4] ss:$8 sps:$4 sm:$0xff]  }
  0x2f   :  { %256 = vmatprep.subr.bf16.mxu0 %v448_v4  ;;  %v468_v20 = vld [vmem:[#allocation5 + $0xf0] ss:$8 sps:$4 sm:$0xff]   ;;  %v469_v21 = vld [vmem:[#allocation5 + $0xe4] ss:$8 sps:$4 sm:$0xff]   ;;  %v471_v22 = vld [vmem:[#allocation5 + $0xe0] ss:$8 sps:$4 sm:$0xff]  }
  0x30   :  { %284 = vmatprep.mubr.bf16.mxu0 %v59_v15  ;;  %v472_v23 = vld [vmem:[#allocation5 + $0xd4] ss:$8 sps:$4 sm:$0xff]   ;;  %v474_v24 = vld [vmem:[#allocation5 + $0xd0] ss:$8 sps:$4 sm:$0xff]   ;;  %v475_v25 = vld [vmem:[#allocation5 + $0xc4] ss:$8 sps:$4 sm:$0xff]  }
  0x31   :  { %v477_v26 = vld [vmem:[#allocation5 + $0xc0] ss:$8 sps:$4 sm:$0xff]   ;;  %v478_v27 = vld [vmem:[#allocation5 + $0xb4] ss:$8 sps:$4 sm:$0xff]   ;;  %v480_v28 = vld [vmem:[#allocation5 + $0xb0] ss:$8 sps:$4 sm:$0xff]  }
  0x32   :  { %257 = vmatpush1.bf16.msra.mxu0 %v450_v5  ;;  %v481_v29 = vld [vmem:[#allocation5 + $0xa4] ss:$8 sps:$4 sm:$0xff]   ;;  %v483_v30 = vld [vmem:[#allocation5 + $0xa0] ss:$8 sps:$4 sm:$0xff]   ;;  %v484_v31 = vld [vmem:[#allocation5 + $0x94] ss:$8 sps:$4 sm:$0xff]  }
  0x33   :  { %258 = vmatprep.subr.bf16.mxu0 %v451_v6  ;;  %v486_v32 = vld [vmem:[#allocation5 + $0x90] ss:$8 sps:$4 sm:$0xff]   ;;  %v487_v33 = vld [vmem:[#allocation5 + $0x84] ss:$8 sps:$4 sm:$0xff]   ;;  %v489_v34 = vld [vmem:[#allocation5 + $0x80] ss:$8 sps:$4 sm:$0xff]  }
  0x34   :  { %v56_v36 = vld [vmem:[#allocation2 + $0x10] sm:$0xff]  ;;  %v358_v40 = vsub.s32 1, %v302_v39  ;;  %v370_v41 = vsub.s32 2, %v302_v39  ;;  %v299_v42 = vld [vmem:[#allocation7] sm:$0xff]  ;;  %v300_v43 = vld [vmem:[#allocation7 + $0x8] sm:$0xff]  ;;  %v303_v48 = vsub.s32 0, %v302_v39 }
  0x35   :  { %v58_v37 = vpack.c.bf16 %v56_v36, %v54_v35  ;;  %vm328_vm0 = vcmp.lt.s32.totalorder %v326_v1, 32  ;;  %s389_s2 = sshll.u32 %s587_s0, 4  ;;  %s390_s2 = int_to_ptr.vmem [resolvable:$true] %s389_s2 }
  0x36   :  { %259 = vmatpush1.bf16.msra.mxu0 %v453_v7  ;;  %v359_v44 = vrot.slane %v299_v42, %v358_v40  ;;  %v371_v45 = vrot.slane %v299_v42, %v370_v41  ;;  %v363_v46 = vrot.slane %v300_v43, %v358_v40  ;;  %v375_v47 = vrot.slane %v300_v43, %v370_v41  ;;  %s554_s30 = scalar_lea.vmem %s390_s2, 512  ;;  %p559_p2 = scmp.lt.s32.totalorder %s390_s2, %s390_s2 }
  0x37   :  { %260 = vmatprep.subr.bf16.mxu0 %v454_v8  ;;  %v304_v51 = vrot.slane %v299_v42, %v303_v48  ;;  %v308_v52 = vrot.slane %v300_v43, %v303_v48  ;;  %p555_p1 = scmp.ne.s32.totalorder %s390_s2, %s554_s30  ;;  %p560_p3 = scmp.lt.s32.totalorder %s554_s30, %s554_s30 }
  0x39   :  { %p561_p4 = por %p560_p3, %p559_p2 }
  0x3a   :  { %261 = vmatpush1.bf16.msra.mxu0 %v456_v9 }
  0x3b   :  { %262 = vmatprep.subr.bf16.mxu0 %v457_v10  ;;  %p562_p5 = pnand %p561_p4, %p555_p1 }
  0x3e   :  { %263 = vmatpush1.bf16.msra.mxu0 %v459_v11 }
  0x3f   :  { %264 = vmatprep.subr.bf16.mxu0 %v460_v12 }
  0x42   :  { %265 = vmatpush1.bf16.msra.mxu0 %v462_v16 }
  0x43   :  { %266 = vmatprep.subr.bf16.mxu0 %v463_v17 }
  0x46   :  { %267 = vmatpush1.bf16.msra.mxu0 %v465_v18 }
  0x47   :  { %268 = vmatprep.subr.bf16.mxu0 %v466_v19 }
  0x4a   :  { %269 = vmatpush2.bf16.msra.mxu0 %v468_v20 }
  0x4b   :  { %270 = vmatprep.subr.bf16.mxu0 %v469_v21 }
  0x4e   :  { %271 = vmatpush2.bf16.msra.mxu0 %v471_v22 }
  0x4f   :  { %272 = vmatprep.subr.bf16.mxu0 %v472_v23 }
  0x52   :  { %273 = vmatpush2.bf16.msra.mxu0 %v474_v24 }
  0x53   :  { %274 = vmatprep.subr.bf16.mxu0 %v475_v25 }
  0x56   :  { %275 = vmatpush2.bf16.msra.mxu0 %v477_v26 }
  0x57   :  { %276 = vmatprep.subr.bf16.mxu0 %v478_v27 }
  0x5a   :  { %277 = vmatpush2.bf16.msra.mxu0 %v480_v28 }
  0x5b   :  { %278 = vmatprep.subr.bf16.mxu0 %v481_v29 }
  0x5e   :  { %279 = vmatpush2.bf16.msra.mxu0 %v483_v30 }
  0x5f   :  { %280 = vmatprep.subr.bf16.mxu0 %v484_v31 }
  0x62   :  { %281 = vmatpush2.bf16.msra.mxu0 %v486_v32 }
  0x63   :  { %282 = vmatprep.subr.bf16.mxu0 %v487_v33 }
  0x66   :  { %283 = vmatpush2.bf16.msra.mxu0 %v489_v34 }
  0x69   :  { %285 = vmatmul.mubr.bf16.vlgmr.msra.gmra.mxu0 %v58_v37 }
 0x129   :  { %v286_v49 = vpop.f32.mrf.mxu0 }
 0x12a   :  { %v295_v50 = vadd.f32 %v286_v49, %v54_v35 }
 0x12b   :  { %v288_v53 = vpop.f32.mrf.mxu0 }
 0x12c   :  { %v296_v54 = vadd.f32 %v288_v53, %v620_v13  ;;  %v309_v57 = vadd.f32 %v304_v51, %v295_v50 }
 0x12d   :  { %v290_v55 = vpop.f32.mrf.mxu0 }
 0x12e   :  { %v297_v56 = vadd.f32 %v290_v55, %v56_v36  ;;  %v310_v58 = vadd.f32 %v308_v52, %v296_v54 }
 0x12f   :  { %v292_v59 = vpop.f32.mrf.mxu0 }
 0x130   :  { %v298_v60 = vadd.f32 %v292_v59, %v622_v14  ;;  %v313_v61 = vadd.f32 %v310_v58, %v309_v57  ;;  %v311_v62 = vadd.f32 %v304_v51, %v297_v56 }
 0x132   :  { %v312_v63 = vadd.f32 %v308_v52, %v298_v60  ;;  %314 = vadd.xlane.f32.xlu0 %v313_v61 }
 0x134   :  { %v316_v0 = vadd.f32 %v312_v63, %v311_v62 }
 0x136   :  { %317 = vadd.xlane.f32.xlu0 %v316_v0 }
 0x1bb   :  { %v315_v2 = vpop.xlane.xlu0 %314 }
 0x1bc   :  { %v319_v3 = vmul.f32 0.03125, %v315_v2 }
 0x1be   :  { %v321_v4 = vsub.f32 %v309_v57, %v319_v3 }
 0x1bf   :  { %v318_v5 = vpop.xlane.xlu0 %317 }
 0x1c0   :  { %v320_v6 = vmul.f32 0.03125, %v318_v5  ;;  %v330_v7 = vsel %vm328_vm0, %v321_v4, 0.0 }
 0x1c1   :  { %v334_v8 = vmul.f32 %v330_v7, %v330_v7 }
 0x1c2   :  { %v323_v9 = vsub.f32 %v311_v62, %v320_v6 }
 0x1c3   :  { %339 = vadd.xlane.f32.xlu1 %v334_v8 }
 0x1c4   :  { %v332_v10 = vsel %vm328_vm0, %v323_v9, 0.0 }
 0x1c5   :  { %v336_v11 = vmul.f32 %v332_v10, %v332_v10 }
 0x1c7   :  { %342 = vadd.xlane.f32.xlu1 %v336_v11 }
 0x24c   :  { %v340_v12 = vpop.xlane.xlu1 %339 }
 0x24d   :  { %v344_v13 = vmul.f32 0.03125, %v340_v12 }
 0x24f   :  { %v346_v14 = vmax.f32 %v344_v13, 0.0 }
 0x250   :  { %v343_v15 = vpop.xlane.xlu1 %342 }
 0x251   :  { %v348_v16 = vadd.f32 1e-05, %v346_v14  ;;  %v345_v17 = vmul.f32 0.03125, %v343_v15 }
 0x253   :  { %490 = vrsqrt.f32 %v348_v16  ;;  %v347_v18 = vmax.f32 %v345_v17, 0.0 }
 0x255   :  { %v349_v19 = vadd.f32 1e-05, %v347_v18 }
 0x257   :  { %492 = vrsqrt.f32 %v349_v19 }
 0x260   :  { %v491_v20 = vpop.eup %490 }
 0x261   :  { %v352_v21 = vmul.f32 %v491_v20, %v330_v7  ;;  %v353_v22 = vmul.f32 0.0, %v491_v20 }
 0x263   :  { %v364_v23 = vmul.f32 %v359_v44, %v352_v21  ;;  %v365_v24 = vmul.f32 %v363_v46, %v353_v22 }
 0x264   :  { %v493_v25 = vpop.eup %492 }
 0x265   :  { %v354_v26 = vmul.f32 %v493_v25, %v332_v10  ;;  %v355_v27 = vmul.f32 0.0, %v493_v25  ;;  %v376_v28 = vadd.f32 %v371_v45, %v364_v23  ;;  %v377_v29 = vadd.f32 %v375_v47, %v365_v24 }
 0x267   :  { %v366_v30 = vmul.f32 %v359_v44, %v354_v26  ;;  %v367_v31 = vmul.f32 %v363_v46, %v355_v27  ;;  %380 = vst [vmem:[#allocation8] sm:$0xff] %v376_v28  ;;  %381 = vst [vmem:[#allocation8 + $0x8] sm:$0xff] %v377_v29 }
 0x269   :  { %v378_v32 = vadd.f32 %v371_v45, %v366_v30  ;;  %v379_v33 = vadd.f32 %v375_v47, %v367_v31 }
 0x26b   :  { %382 = vst [vmem:[#allocation8 + $0x10] sm:$0xff] %v378_v32  ;;  %383 = vst [vmem:[#allocation8 + $0x18] sm:$0xff] %v379_v33 }
 0x26c   :  { %565 = shalt.err (!%p562_p5)
}
 0x26d   :  { %395 = dma.vmem_to_hbm [thread:$0]  %s390_s2, 512, %s637_s3, [#allocation4], %s584_s22, %s584_s22, %s585_s23  }
 0x26e   :  { %578 = dma.done.wait [#allocation4], 512  }
 0x26f   :  { %579 = vsyncadd [#allocation4], 4294966784 }
 0x270   :  { %399 = vsyncpa [#allocation3], 1 }
 0x271   :  { %400 = vsyncpa [#allocation6], 1 }
 0x272   :  { %401 = vsyncpa [#allocation4], 1 }

</bundles_post_ra>
